<compile_context>
chip_gen: v5e
topology: v5e:2x2
jax: 0.10.0
libtpu: 0.0.40
codegen_flags: <defaults>
</compile_context>

<pallas_src>
import functools

import jax
import jax.numpy as jnp
from jax.experimental import pallas as pl
from jax.experimental.pallas import tpu as pltpu

ALPHA = 0.014


def _relup_kernel(x_ref, o_ref, *, alpha):
    # (tile_rows, cols) lane-dense VMEM tile.  Pure VPU max in the native
    # dtype (alpha itself rounds to the ref dtype, same as torch clamping a
    # bf16 tensor).
    o_ref[...] = jnp.maximum(x_ref[...], jnp.asarray(alpha, dtype=o_ref.dtype))


def _choose_cols(n_elems):
    """Pick a lane-dense column width (multiple of 128).

    Returns (cols, pad): pad > 0 only when no 128-multiple divides n_elems,
    in which case the flat array is zero-padded to rows * cols.
    """
    for cols in (1024, 512, 384, 256, 128):
        if n_elems % cols == 0:
            return cols, 0
    cols = 512
    return cols, (-n_elems) % cols


def relup_forward(x, alpha=ALPHA, *, block_bytes=4 * 1024 * 1024, donate_input=False):
    """Elementwise clamp(min=alpha), matching relup.forward for any shape/dtype."""
    orig_shape = x.shape
    dtype = x.dtype
    n = x.size
    if n == 0:
        return x
    itemsize = jnp.dtype(dtype).itemsize

    # --- flatten to a lane-dense 2-D slab --------------------------------
    cols, pad = _choose_cols(n)
    x_flat = x.reshape(-1)
    if pad:
        # TODO(synk): padded fallback costs one extra XLA copy; only hit when
        # the element count has no 128-multiple divisor.
        x_flat = jnp.pad(x_flat, (0, pad))
    rows = (n + pad) // cols
    x2 = x_flat.reshape(rows, cols)

    # --- cdiv row tiling: ~block_bytes blocks, >=2 steps when possible ----
    row_bytes = cols * itemsize
    sublane = max(8, 32 // itemsize)  # 8 for f32, 16 for bf16, 32 for int8/fp8
    tile_rows = min(rows, max(1, block_bytes // row_bytes))
    if rows > sublane:
        # Ensure at least 2 grid steps so v7x's two TensorCores both stream.
        tile_rows = min(tile_rows, pl.cdiv(rows, 2))
    if tile_rows < rows:
        tile_rows = max(sublane, (tile_rows // sublane) * sublane)
        tile_rows = min(tile_rows, rows)
    grid = (pl.cdiv(rows, tile_rows),)

    block_sz = tile_rows * row_bytes
    # Cover 2x double-buffered (in + out) blocks plus headroom; stays under
    # every generation's physical VMEM (64 MiB on v7x).
    vmem_limit = int(min(48 * 1024 * 1024, max(32 * 1024 * 1024, 4 * block_sz + (4 << 20))))

    kernel = functools.partial(_relup_kernel, alpha=alpha)
    out2 = pl.pallas_call(
        kernel,
        out_shape=jax.ShapeDtypeStruct((rows, cols), dtype),
        grid=grid,
        in_specs=[pl.BlockSpec((tile_rows, cols), lambda i: (i, 0))],
        out_specs=pl.BlockSpec((tile_rows, cols), lambda i: (i, 0)),
        compiler_params=pltpu.CompilerParams(
            dimension_semantics=("parallel",),
            vmem_limit_bytes=vmem_limit,
        ),
        cost_estimate=pl.CostEstimate(
            flops=rows * cols,                          # one max per element
            transcendentals=0,
            bytes_accessed=2 * rows * cols * itemsize,  # read + write
        ),
        input_output_aliases=({0: 0} if donate_input else {}),
    )(x2)

    out_flat = out2.reshape(-1)
    if pad:
        out_flat = out_flat[:n]
    return out_flat.reshape(orig_shape)


def relup_reference(x, alpha=ALPHA):
    """Pure-JAX reference mirroring torch.clamp(x, min=alpha)."""
    return jnp.maximum(x, jnp.asarray(alpha, dtype=x.dtype))


if __name__ == "__main__":
    # Small NCHW shapes consistent with the module's use on CNN feature maps.
    B, C, H, W = 2, 4, 16, 16
    key = jax.random.PRNGKey(0)
    x = jax.random.normal(key, (B, C, H, W), dtype=jnp.float32)

    out = jax.block_until_ready(relup_forward(x))
    ref = relup_reference(x)
    assert out.shape == x.shape and out.dtype == x.dtype
    assert jnp.array_equal(out, ref), "mismatch vs reference (f32)"
    assert float(jnp.min(out)) >= ALPHA - 1e-7, "clamp floor violated"

    # 7x7 feature map: element count not a multiple of 128 -> padded fallback.
    x_odd = jax.random.normal(jax.random.PRNGKey(1), (1, 3, 7, 7), dtype=jnp.float32)
    o_odd = jax.block_until_ready(relup_forward(x_odd))
    assert jnp.array_equal(o_odd, relup_reference(x_odd)), "mismatch (padded path)"

    # bf16 + multi-step ragged grid + donated-input alias variant.
    x_bf = jax.random.normal(jax.random.PRNGKey(2), (2, 16, 28, 28), dtype=jnp.bfloat16)
    o_bf = jax.block_until_ready(relup_forward(x_bf, donate_input=True))
    assert o_bf.dtype == jnp.bfloat16
    assert jnp.array_equal(o_bf, relup_reference(x_bf)), "mismatch (bf16 path)"

    print("KERNEL_OK")
</pallas_src>

<mosaic_0001>
module attributes {stable_mosaic.version = 11 : i64} {
  func.func @_relup_kernel(%arg0: i32, %arg1: memref<2x1024xf32, #tpu.memory_space<vmem>>, %arg2: memref<2x1024xf32, #tpu.memory_space<vmem>>) attributes {dimension_semantics = [#tpu.dimension_semantics<parallel>], iteration_bounds = array<i64: 1>, scalar_prefetch = 0 : i64, scratch_operands = 0 : i64, tpu.core_type = #tpu.core_type<tc>, window_params = [{transform_indices = @transform_0, window_bounds = array<i64: 2, 1024>}, {transform_indices = @transform_1, window_bounds = array<i64: 2, 1024>}]} {
    %c0 = arith.constant 0 : index
    %c0_0 = arith.constant 0 : index
    %0 = vector.load %arg1[%c0, %c0_0] : memref<2x1024xf32, #tpu.memory_space<vmem>>, vector<2x1024xf32>
    %cst = arith.constant 1.400000e-02 : f32
    %1 = vector.broadcast %cst : f32 to vector<2x1024xf32>
    %2 = arith.maximumf %0, %1 : vector<2x1024xf32>
    %c0_1 = arith.constant 0 : index
    %c0_2 = arith.constant 0 : index
    %3 = vector.load %arg2[%c0_1, %c0_2] : memref<2x1024xf32, #tpu.memory_space<vmem>>, vector<2x1024xf32>
    tpu.vector_store %arg2[%c0_1, %c0_2], %2 {strides = array<i32>} : memref<2x1024xf32, #tpu.memory_space<vmem>>, vector<2x1024xf32>,
    return
  }
  func.func @transform_0(%arg0: i32) -> (i32, i32) {
    %c0_i32 = arith.constant 0 : i32
    %c0_i32_0 = arith.constant 0 : i32
    return %arg0, %c0_i32 : i32, i32
  }
  func.func @transform_1(%arg0: i32) -> (i32, i32) {
    %c0_i32 = arith.constant 0 : i32
    %c0_i32_0 = arith.constant 0 : i32
    return %arg0, %c0_i32 : i32, i32
  }
}

</mosaic_0001>

<bundles_post_ra>
// kernel: tpu_custom_call.1
= control target key start
LH: loop header
LB: loop body
LE: loop exit
PB: predicated region body
PF: predicated region fallthrough
CT: control target
= control target key end

     0   :  { %6 = vsyncpa [#allocation3], 0  ;;  %s118_s0 = inlined_call_operand.hbm [shape: f32[2,1024], index: 0, kind: input, shape index: {}]   ;;  %s119_s1 = inlined_call_operand.hbm [shape: f32[2,1024], index: 1, kind: output, shape index: {}]  }
   0x1   :  { %7 = vsyncpa [#allocation4], 0  ;;  %s13_s8 = sshll.u32 %s118_s0, 4  ;;  %s100_s9 = smov [#allocation2]   ;;  %s14_s8 = int_to_ptr.hbm [resolvable:$true] %s13_s8 }
   0x2   :  { %s15_s10 = sshll.u32 %s100_s9, 4  ;;  %s16_s10 = int_to_ptr.vmem [resolvable:$true] %s15_s10 }
   0x3   :  { %18 = dma.hbm_to_vmem [thread:$0]  %s14_s8, 256, %s16_s10, [#allocation3]  }
   0x4   :  { %96 = dma.done.wait [#allocation3], 256  }
   0x5   :  { %97 = vsyncadd [#allocation3], 4294967040  ;;  %s101_s11 = smov [#allocation5]   ;;  %s36_s15 = sshll.u32 %s119_s1, 4  ;;  %v23_v0 = vld [vmem:[#allocation2] sm:$0xff]  ;;  %v24_v1 = vld [vmem:[#allocation2 + $0x8] sm:$0xff]  ;;  %s37_s15 = int_to_ptr.hbm [resolvable:$true] %s36_s15 }
   0x6   :  { %s34_s12 = sshll.u32 %s101_s11, 4  ;;  %v25_v2 = vmax.f32 %v23_v0, 0.014  ;;  %v26_v3 = vmax.f32 %v24_v1, 0.014  ;;  %s35_s12 = int_to_ptr.vmem [resolvable:$true] %s34_s12 }
   0x8   :  { %27 = vst [vmem:[#allocation5] sm:$0xff] %v25_v2 }
   0x9   :  { %28 = vst [vmem:[#allocation5 + $0x8] sm:$0xff] %v26_v3 }
   0xa   :  { %39 = dma.vmem_to_hbm [thread:$0]  %s35_s12, 256, %s37_s15, [#allocation4]  }
   0xb   :  { %98 = dma.done.wait [#allocation4], 256  }
   0xc   :  { %99 = vsyncadd [#allocation4], 4294967040 }
   0xd   :  { %44 = vsyncpa [#allocation3], 1 }
   0xe   :  { %45 = vsyncpa [#allocation4], 1 }

</bundles_post_ra>
